<compile_context>
chip_gen: v7x
topology: tpu7x:2x2x1
jax: 0.10.0
libtpu: 0.0.40
codegen_flags: <defaults>
</compile_context>

<pallas_src>
import jax
import jax.numpy as jnp
from jax.experimental import pallas as pl
from jax.experimental.pallas import tpu as pltpu

# Module "parameters" (from __init__) — fixed deterministically in-script.
KL_MARGIN = 3.0
LAMBDA_EDGE = 1.0
LAMBDA_NOT_EDGE = 1.0
IGNORE_LB = 255


def _affinity_kernel(logits_ref, labels_ref, loss_ref, ign_ref,
                     prev_probs_ref, prev_labels_ref):
    j = pl.program_id(1)                             # H-tile index (innermost, sequential)

    logits = logits_ref[...].astype(jnp.float32)     # (C, TH, W) — upcast in-kernel
    labels = labels_ref[...].astype(jnp.int32)       # (TH, W)
    c, th, w = logits.shape

    # ---- channel softmax (axis 0 is a leading dim -> cross-vreg VPU reduce) ----
    m = jnp.max(logits, axis=0, keepdims=True)
    e = jnp.exp(logits - m)
    denom = jnp.sum(e, axis=0, keepdims=True)
    # Hoisted divide: one reciprocal of the (1, TH, W) denominator + C multiplies.
    # (approx=True would move it fully onto the EUP at a small numerics cost.)
    probs = e * pl.reciprocal(denom, approx=False)

    ign = labels == IGNORE_LB

    # ---- 1-row halo: last row of the previous H tile (same batch element) ----
    prev_p = prev_probs_ref[...]                     # (C, 1, W)
    prev_l = prev_labels_ref[...]                    # (1, W)

    row_idx = jax.lax.broadcasted_iota(jnp.int32, (th, w), 0)
    col_idx = jax.lax.broadcasted_iota(jnp.int32, (th, w), 1)
    is_row0 = row_idx == 0

    # Row above every pixel: full-tile roll with the carried row patched into row 0.
    # Wrap garbage / the j==0 stale carry are masked out of the final loss below.
    probs_up = jnp.where(is_row0[None, :, :], prev_p, jnp.roll(probs, 1, axis=1))
    labels_up = jnp.where(is_row0, prev_l, jnp.roll(labels, 1, axis=0))

    not_top = jnp.logical_or(row_idx > 0, j > 0)     # global row >= 1
    not_last_col = col_idx < (w - 1)
    not_first_col = col_idx > 0

    # Zero the (revisited) per-batch output accumulators at the first H tile.
    @pl.when(j == 0)
    def _():
        loss_ref[...] = jnp.zeros_like(loss_ref)
        ign_ref[...] = jnp.zeros_like(ign_ref)

    zero = jnp.float32(0.0)

    def pair_terms(q_probs, q_labels, valid):
        # One unordered neighbour pair (p = this pixel, q = neighbour); both
        # (edge, center) orientations of the reference's 8 terms are added here.
        # NOTE: faithful to the reference, which uses probs (not log-probs) in its
        # "KL" expression, and which zeroes kld (not the loss) for ignored pixels.
        q_ign = q_labels == IGNORE_LB
        pair_ok = jnp.logical_not(ign | q_ign)
        diff = probs - q_probs
        kld_pq = jnp.sum(probs * diff, axis=0)       # p is "edge", q is "center"
        kld_qp = jnp.sum(q_probs * (-diff), axis=0)  # q is "edge", p is "center"
        kld_pq = jnp.where(pair_ok, kld_pq, zero)
        kld_qp = jnp.where(pair_ok, kld_qp, zero)
        same = labels == q_labels
        l_pq = jnp.where(same, LAMBDA_EDGE * kld_pq,
                         LAMBDA_NOT_EDGE * jnp.maximum(KL_MARGIN - kld_pq, zero))
        l_qp = jnp.where(same, LAMBDA_EDGE * kld_qp,
                         LAMBDA_NOT_EDGE * jnp.maximum(KL_MARGIN - kld_qp, zero))
        # Boundary/wrap mask applied to the FINAL loss (relu branch is nonzero at kld=0).
        return jnp.where(valid, l_pq + l_qp, zero)

    total = pair_terms(jnp.roll(probs, -1, axis=2),              # right neighbour
                       jnp.roll(labels, -1, axis=1), not_last_col)
    total = total + pair_terms(probs_up, labels_up, not_top)     # up neighbour
    total = total + pair_terms(jnp.roll(probs_up, -1, axis=2),   # up-right neighbour
                               jnp.roll(labels_up, -1, axis=1),
                               not_top & not_last_col)
    total = total + pair_terms(jnp.roll(probs_up, 1, axis=2),    # up-left neighbour
                               jnp.roll(labels_up, 1, axis=1),
                               not_top & not_first_col)

    # Pure elementwise accumulation into the revisited output blocks (no in-loop
    # cross-lane reductions).
    loss_ref[...] += total
    ign_ref[...] += ign.astype(jnp.float32)

    # Carry this tile's last row into the next H tile (j is the innermost grid axis).
    prev_probs_ref[...] = probs[:, th - 1:th, :]
    prev_labels_ref[...] = labels[th - 1:th, :]


def _pick_block_h(h, c, w, budget_bytes=2 << 20):
    # Largest H tile (multiple of 8, or the full H) whose f32 logits block fits the
    # budget — sized conservatively so double-buffered inputs + temporaries stay well
    # under v7x's 64 MiB VMEM.
    divisors = [d for d in range(1, h + 1) if h % d == 0]
    ok = [d for d in divisors if d % 8 == 0 or d == h]
    fits = [d for d in ok if c * d * w * 4 <= budget_bytes]
    return max(fits) if fits else min(ok)


def affinity_field_loss(logits, labels, *, block_h=None):
    """Forward pass of AffinityFieldLoss.  logits: (N, C, H, W), labels: (N, H, W)."""
    n, c, h, w = logits.shape
    assert labels.shape == (n, h, w)
    if block_h is None:
        block_h = _pick_block_h(h, c, w)
    if h % block_h != 0 or not (block_h % 8 == 0 or block_h == h):
        raise ValueError(f"block_h={block_h} must divide H={h} and be a multiple of 8 "
                         "(or equal to H).")
    n_h_tiles = h // block_h

    # Inputs are passed in their native dtypes (e.g. bf16 logits, int32 labels) and
    # upcast inside the kernel — no wrapper-side astype / extra HBM copies.
    loss_part, ign_part = pl.pallas_call(
        _affinity_kernel,
        out_shape=(
            jax.ShapeDtypeStruct((n, block_h, w), jnp.float32),   # per-pixel loss partials
            jax.ShapeDtypeStruct((n, block_h, w), jnp.float32),   # per-pixel ignore partials
        ),
        grid_spec=pltpu.PrefetchScalarGridSpec(
            num_scalar_prefetch=0,
            grid=(n, n_h_tiles),
            in_specs=[
                pl.BlockSpec((None, c, block_h, w), lambda i, j: (i, 0, j, 0)),
                pl.BlockSpec((None, block_h, w), lambda i, j: (i, j, 0)),
            ],
            out_specs=[
                pl.BlockSpec((None, block_h, w), lambda i, j: (i, 0, 0)),
                pl.BlockSpec((None, block_h, w), lambda i, j: (i, 0, 0)),
            ],
            scratch_shapes=[
                pltpu.VMEM((c, 1, w), jnp.float32),   # carried probs row (H-tile halo)
                pltpu.VMEM((1, w), jnp.int32),        # carried labels row
            ],
        ),
        compiler_params=pltpu.CompilerParams(
            dimension_semantics=("parallel", "arbitrary"),
            vmem_limit_bytes=48 * 1024 * 1024,
        ),
    )(logits, labels)

    # Tiny epilogue: one reduction + one scalar divide (hoisted out of the hot loop).
    loss_sum = jnp.sum(loss_part)
    n_valid = jnp.float32(n * h * w) - jnp.sum(ign_part)
    return loss_sum / (8.0 * n_valid)


# ---------------------------------------------------------------------------
# Pure-JAX reference mirroring the PyTorch module exactly (slice-based), used to
# validate the roll/mask + halo reformulation inside the kernel.
# ---------------------------------------------------------------------------
_INDICES = [
    (((1, None), (None, None)), ((None, -1), (None, None))),
    (((None, -1), (None, None)), ((1, None), (None, None))),
    (((None, None), (1, None)), ((None, None), (None, -1))),
    (((None, None), (None, -1)), ((None, None), (1, None))),
    (((1, None), (1, None)), ((None, -1), (None, -1))),
    (((1, None), (None, -1)), ((None, -1), (1, None))),
    (((None, -1), (1, None)), ((1, None), (None, -1))),
    (((None, -1), (None, -1)), ((1, None), (1, None))),
]


def _slice_hw(x, hs, ws):
    return x[..., hs[0]:hs[1], ws[0]:ws[1]]


def affinity_field_loss_ref(logits, labels):
    probs = jax.nn.softmax(logits.astype(jnp.float32), axis=1)
    ignore = labels == IGNORE_LB
    n_valid = labels.size - jnp.sum(ignore).astype(jnp.float32)
    losses = []
    for (chs, cws), (ehs, ews) in _INDICES:
        lbc = _slice_hw(labels, chs, cws)
        lbe = _slice_hw(labels, ehs, ews)
        ignc = _slice_hw(ignore, chs, cws)
        igne = _slice_hw(ignore, ehs, ews)
        pc = _slice_hw(probs, chs, cws)
        pe = _slice_hw(probs, ehs, ews)
        kld = jnp.sum(pe * (pe - pc), axis=1)
        kld = jnp.where(igne | ignc, 0.0, kld)
        loss = jnp.where(
            lbc == lbe,
            LAMBDA_EDGE * kld,
            LAMBDA_NOT_EDGE * jnp.maximum(KL_MARGIN - kld, 0.0),
        )
        losses.append(jnp.sum(loss) / n_valid)
    return sum(losses) / 8.0


if __name__ == "__main__":
    key = jax.random.PRNGKey(0)
    k1, k2, k3 = jax.random.split(key, 3)
    N, C, H, W = 2, 4, 16, 16
    # Native bf16 logits (halves HBM->VMEM bytes); int32 labels with some ignore pixels.
    logits = jax.random.normal(k1, (N, C, H, W), dtype=jnp.float32).astype(jnp.bfloat16)
    labels = jax.random.randint(k2, (N, H, W), 0, C, dtype=jnp.int32)
    ignore_mask = jax.random.bernoulli(k3, 0.1, (N, H, W))
    labels = jnp.where(ignore_mask, IGNORE_LB, labels)

    # block_h=8 < H exercises the multi-tile path + carried-row halo.
    out = jax.block_until_ready(affinity_field_loss(logits, labels, block_h=8))
    ref = affinity_field_loss_ref(logits, labels)
    assert jnp.allclose(out, ref, rtol=1e-4, atol=1e-5), (out, ref)
    print("KERNEL_OK")
</pallas_src>

<mosaic_0001>
module attributes {stable_mosaic.version = 11 : i64} {
  func.func @_affinity_kernel(%arg0: i32, %arg1: i32, %arg2: memref<1x4x8x16xbf16, #tpu.memory_space<vmem>>, %arg3: memref<1x8x16xi32, #tpu.memory_space<vmem>>, %arg4: memref<1x8x16xf32, #tpu.memory_space<vmem>>, %arg5: memref<1x8x16xf32, #tpu.memory_space<vmem>>, %arg6: memref<4x1x16xf32, #tpu.memory_space<vmem>>, %arg7: memref<1x16xi32, #tpu.memory_space<vmem>>) attributes {dimension_semantics = [#tpu.dimension_semantics<parallel>, #tpu.dimension_semantics<arbitrary>], iteration_bounds = array<i64: 2, 2>, scalar_prefetch = 0 : i64, scratch_operands = 2 : i64, tpu.core_type = #tpu.core_type<tc>, window_params = [{transform_indices = @transform_0, window_bounds = array<i64: 1, 4, 8, 16>}, {transform_indices = @transform_1, window_bounds = array<i64: 1, 8, 16>}, {transform_indices = @transform_2, window_bounds = array<i64: 1, 8, 16>}, {transform_indices = @transform_3, window_bounds = array<i64: 1, 8, 16>}]} {
    %c0 = arith.constant 0 : index
    %c0_0 = arith.constant 0 : index
    %c0_1 = arith.constant 0 : index
    %c0_2 = arith.constant 0 : index
    %0 = vector.load %arg2[%c0, %c0_0, %c0_1, %c0_2] : memref<1x4x8x16xbf16, #tpu.memory_space<vmem>>, vector<1x4x8x16xbf16>
    %1 = vector.shape_cast %0 : vector<1x4x8x16xbf16> to vector<4x8x16xbf16>
    %2 = arith.extf %1 : vector<4x8x16xbf16> to vector<4x8x16xf32>
    %c0_3 = arith.constant 0 : index
    %c0_4 = arith.constant 0 : index
    %c0_5 = arith.constant 0 : index
    %3 = vector.load %arg3[%c0_3, %c0_4, %c0_5] : memref<1x8x16xi32, #tpu.memory_space<vmem>>, vector<1x8x16xi32>
    %4 = vector.shape_cast %3 : vector<1x8x16xi32> to vector<8x16xi32>
    %cst = arith.constant dense<0xFF800000> : vector<8x16xf32>
    %5 = vector.multi_reduction <maximumf>, %2, %cst [0] : vector<4x8x16xf32> to vector<8x16xf32>
    %6 = vector.shape_cast %5 : vector<8x16xf32> to vector<1x8x16xf32>
    %7 = vector.broadcast %6 : vector<1x8x16xf32> to vector<4x8x16xf32>
    %8 = arith.subf %2, %7 : vector<4x8x16xf32>
    %9 = math.exp %8 : vector<4x8x16xf32>
    %cst_6 = arith.constant dense<0.000000e+00> : vector<8x16xf32>
    %10 = vector.multi_reduction <add>, %9, %cst_6 [0] : vector<4x8x16xf32> to vector<8x16xf32>
    %11 = vector.shape_cast %10 : vector<8x16xf32> to vector<1x8x16xf32>
    %12 = tpu.reciprocal %11 : vector<1x8x16xf32> -> vector<1x8x16xf32>
    %13 = vector.broadcast %12 : vector<1x8x16xf32> to vector<4x8x16xf32>
    %14 = arith.mulf %9, %13 : vector<4x8x16xf32>
    %c255_i32 = arith.constant 255 : i32
    %15 = vector.broadcast %c255_i32 : i32 to vector<8x16xi32>
    %16 = arith.cmpi eq, %4, %15 : vector<8x16xi32>
    %c0_7 = arith.constant 0 : index
    %c0_8 = arith.constant 0 : index
    %c0_9 = arith.constant 0 : index
    %17 = vector.load %arg6[%c0_7, %c0_8, %c0_9] : memref<4x1x16xf32, #tpu.memory_space<vmem>>, vector<4x1x16xf32>
    %c0_10 = arith.constant 0 : index
    %c0_11 = arith.constant 0 : index
    %18 = vector.load %arg7[%c0_10, %c0_11] : memref<1x16xi32, #tpu.memory_space<vmem>>, vector<1x16xi32>
    %19 = tpu.iota {dimensions = array<i32: 0>} : vector<8x16xi32>
    %20 = tpu.iota {dimensions = array<i32: 1>} : vector<8x16xi32>
    %c0_i32 = arith.constant 0 : i32
    %21 = vector.broadcast %c0_i32 : i32 to vector<8x16xi32>
    %22 = arith.cmpi eq, %19, %21 : vector<8x16xi32>
    %23 = vector.shape_cast %22 : vector<8x16xi1> to vector<1x8x16xi1>
    %24 = vector.extract_strided_slice %14 {offsets = [0, 7, 0], sizes = [4, 1, 16], strides = [1, 1, 1]} : vector<4x8x16xf32> to vector<4x1x16xf32>
    %25 = vector.extract_strided_slice %14 {offsets = [0, 0, 0], sizes = [4, 7, 16], strides = [1, 1, 1]} : vector<4x8x16xf32> to vector<4x7x16xf32>
    %26 = tpu.concatenate %24, %25 in 1 : vector<4x1x16xf32>, vector<4x7x16xf32> -> vector<4x8x16xf32>
    %27 = vector.shape_cast %23 : vector<1x8x16xi1> to vector<1x8x16xi1>
    %28 = vector.broadcast %27 : vector<1x8x16xi1> to vector<4x8x16xi1>
    %29 = vector.shape_cast %17 : vector<4x1x16xf32> to vector<4x1x16xf32>
    %30 = vector.broadcast %29 : vector<4x1x16xf32> to vector<4x8x16xf32>
    %31 = arith.select %28, %30, %26 : vector<4x8x16xi1>, vector<4x8x16xf32>
    %32 = vector.extract_strided_slice %4 {offsets = [7, 0], sizes = [1, 16], strides = [1, 1]} : vector<8x16xi32> to vector<1x16xi32>
    %33 = vector.extract_strided_slice %4 {offsets = [0, 0], sizes = [7, 16], strides = [1, 1]} : vector<8x16xi32> to vector<7x16xi32>
    %34 = tpu.concatenate %32, %33 in 0 : vector<1x16xi32>, vector<7x16xi32> -> vector<8x16xi32>
    %35 = vector.shape_cast %18 : vector<1x16xi32> to vector<1x16xi32>
    %36 = vector.broadcast %35 : vector<1x16xi32> to vector<8x16xi32>
    %37 = arith.select %22, %36, %34 : vector<8x16xi1>, vector<8x16xi32>
    %c0_i32_12 = arith.constant 0 : i32
    %38 = vector.broadcast %c0_i32_12 : i32 to vector<8x16xi32>
    %39 = arith.cmpi sgt, %19, %38 : vector<8x16xi32>
    %c0_i32_13 = arith.constant 0 : i32
    %40 = arith.cmpi sgt, %arg1, %c0_i32_13 : i32
    %41 = vector.broadcast %40 : i1 to vector<8x16xi1>
    %42 = arith.ori %39, %41 : vector<8x16xi1>
    %c15_i32 = arith.constant 15 : i32
    %43 = vector.broadcast %c15_i32 : i32 to vector<8x16xi32>
    %44 = arith.cmpi slt, %20, %43 : vector<8x16xi32>
    %c0_i32_14 = arith.constant 0 : i32
    %45 = vector.broadcast %c0_i32_14 : i32 to vector<8x16xi32>
    %46 = arith.cmpi sgt, %20, %45 : vector<8x16xi32>
    %c0_i32_15 = arith.constant 0 : i32
    %47 = arith.cmpi eq, %arg1, %c0_i32_15 : i32
    %48 = arith.extui %47 : i1 to i32
    %c0_i32_16 = arith.constant 0 : i32
    %49 = arith.cmpi ne, %48, %c0_i32_16 : i32
    scf.if %49 {
      %cst_98 = arith.constant 0.000000e+00 : f32
      %239 = vector.broadcast %cst_98 : f32 to vector<8x16xf32>
      %c0_99 = arith.constant 0 : index
      %c0_100 = arith.constant 0 : index
      %c0_101 = arith.constant 0 : index
      %240 = vector.load %arg4[%c0_99, %c0_100, %c0_101] : memref<1x8x16xf32, #tpu.memory_space<vmem>>, vector<1x8x16xf32>
      %241 = vector.shape_cast %240 : vector<1x8x16xf32> to vector<8x16xf32>
      %242 = vector.shape_cast %239 : vector<8x16xf32> to vector<1x8x16xf32>
      tpu.vector_store %arg4[%c0_99, %c0_100, %c0_101], %242 {strides = array<i32>} : memref<1x8x16xf32, #tpu.memory_space<vmem>>, vector<1x8x16xf32>,
      %cst_102 = arith.constant 0.000000e+00 : f32
      %243 = vector.broadcast %cst_102 : f32 to vector<8x16xf32>
      %c0_103 = arith.constant 0 : index
      %c0_104 = arith.constant 0 : index
      %c0_105 = arith.constant 0 : index
      %244 = vector.load %arg5[%c0_103, %c0_104, %c0_105] : memref<1x8x16xf32, #tpu.memory_space<vmem>>, vector<1x8x16xf32>
      %245 = vector.shape_cast %244 : vector<1x8x16xf32> to vector<8x16xf32>
      %246 = vector.shape_cast %243 : vector<8x16xf32> to vector<1x8x16xf32>
      tpu.vector_store %arg5[%c0_103, %c0_104, %c0_105], %246 {strides = array<i32>} : memref<1x8x16xf32, #tpu.memory_space<vmem>>, vector<1x8x16xf32>,
    } else {
    }
    %50 = vector.extract_strided_slice %14 {offsets = [0, 0, 1], sizes = [4, 8, 15], strides = [1, 1, 1]} : vector<4x8x16xf32> to vector<4x8x15xf32>
    %51 = vector.extract_strided_slice %14 {offsets = [0, 0, 0], sizes = [4, 8, 1], strides = [1, 1, 1]} : vector<4x8x16xf32> to vector<4x8x1xf32>
    %52 = tpu.concatenate %50, %51 in 2 : vector<4x8x15xf32>, vector<4x8x1xf32> -> vector<4x8x16xf32>
    %53 = vector.extract_strided_slice %4 {offsets = [0, 1], sizes = [8, 15], strides = [1, 1]} : vector<8x16xi32> to vector<8x15xi32>
    %54 = vector.extract_strided_slice %4 {offsets = [0, 0], sizes = [8, 1], strides = [1, 1]} : vector<8x16xi32> to vector<8x1xi32>
    %55 = tpu.concatenate %53, %54 in 1 : vector<8x15xi32>, vector<8x1xi32> -> vector<8x16xi32>
    %c255_i32_17 = arith.constant 255 : i32
    %56 = vector.broadcast %c255_i32_17 : i32 to vector<8x16xi32>
    %57 = arith.cmpi eq, %55, %56 : vector<8x16xi32>
    %58 = arith.ori %16, %57 : vector<8x16xi1>
    %cst_18 = arith.constant dense<true> : vector<8x16xi1>
    %59 = arith.xori %58, %cst_18 : vector<8x16xi1>
    %60 = arith.subf %14, %52 : vector<4x8x16xf32>
    %61 = arith.mulf %14, %60 : vector<4x8x16xf32>
    %cst_19 = arith.constant dense<0.000000e+00> : vector<8x16xf32>
    %62 = vector.multi_reduction <add>, %61, %cst_19 [0] : vector<4x8x16xf32> to vector<8x16xf32>
    %cst_20 = arith.constant 0.000000e+00 : f32
    %63 = vector.broadcast %cst_20 : f32 to vector<4x8x16xf32>
    %64 = arith.subf %63, %60 : vector<4x8x16xf32>
    %65 = arith.mulf %52, %64 : vector<4x8x16xf32>
    %cst_21 = arith.constant dense<0.000000e+00> : vector<8x16xf32>
    %66 = vector.multi_reduction <add>, %65, %cst_21 [0] : vector<4x8x16xf32> to vector<8x16xf32>
    %cst_22 = arith.constant 0.000000e+00 : f32
    %67 = vector.broadcast %cst_22 : f32 to vector<8x16xf32>
    %68 = arith.select %59, %62, %67 : vector<8x16xi1>, vector<8x16xf32>
    %cst_23 = arith.constant 0.000000e+00 : f32
    %69 = vector.broadcast %cst_23 : f32 to vector<8x16xf32>
    %70 = arith.select %59, %66, %69 : vector<8x16xi1>, vector<8x16xf32>
    %71 = arith.cmpi eq, %4, %55 : vector<8x16xi32>
    %cst_24 = arith.constant 1.000000e+00 : f32
    %72 = vector.broadcast %cst_24 : f32 to vector<8x16xf32>
    %73 = arith.mulf %72, %68 : vector<8x16xf32>
    %cst_25 = arith.constant 3.000000e+00 : f32
    %74 = vector.broadcast %cst_25 : f32 to vector<8x16xf32>
    %75 = arith.subf %74, %68 : vector<8x16xf32>
    %cst_26 = arith.constant 0.000000e+00 : f32
    %76 = vector.broadcast %cst_26 : f32 to vector<8x16xf32>
    %77 = arith.maximumf %75, %76 : vector<8x16xf32>
    %cst_27 = arith.constant 1.000000e+00 : f32
    %78 = vector.broadcast %cst_27 : f32 to vector<8x16xf32>
    %79 = arith.mulf %78, %77 : vector<8x16xf32>
    %80 = arith.select %71, %73, %79 : vector<8x16xi1>, vector<8x16xf32>
    %cst_28 = arith.constant 1.000000e+00 : f32
    %81 = vector.broadcast %cst_28 : f32 to vector<8x16xf32>
    %82 = arith.mulf %81, %70 : vector<8x16xf32>
    %cst_29 = arith.constant 3.000000e+00 : f32
    %83 = vector.broadcast %cst_29 : f32 to vector<8x16xf32>
    %84 = arith.subf %83, %70 : vector<8x16xf32>
    %cst_30 = arith.constant 0.000000e+00 : f32
    %85 = vector.broadcast %cst_30 : f32 to vector<8x16xf32>
    %86 = arith.maximumf %84, %85 : vector<8x16xf32>
    %cst_31 = arith.constant 1.000000e+00 : f32
    %87 = vector.broadcast %cst_31 : f32 to vector<8x16xf32>
    %88 = arith.mulf %87, %86 : vector<8x16xf32>
    %89 = arith.select %71, %82, %88 : vector<8x16xi1>, vector<8x16xf32>
    %90 = arith.addf %80, %89 : vector<8x16xf32>
    %cst_32 = arith.constant 0.000000e+00 : f32
    %91 = vector.broadcast %cst_32 : f32 to vector<8x16xf32>
    %92 = arith.select %44, %90, %91 : vector<8x16xi1>, vector<8x16xf32>
    %c255_i32_33 = arith.constant 255 : i32
    %93 = vector.broadcast %c255_i32_33 : i32 to vector<8x16xi32>
    %94 = arith.cmpi eq, %37, %93 : vector<8x16xi32>
    %95 = arith.ori %16, %94 : vector<8x16xi1>
    %cst_34 = arith.constant dense<true> : vector<8x16xi1>
    %96 = arith.xori %95, %cst_34 : vector<8x16xi1>
    %97 = arith.subf %14, %31 : vector<4x8x16xf32>
    %98 = arith.mulf %14, %97 : vector<4x8x16xf32>
    %cst_35 = arith.constant dense<0.000000e+00> : vector<8x16xf32>
    %99 = vector.multi_reduction <add>, %98, %cst_35 [0] : vector<4x8x16xf32> to vector<8x16xf32>
    %cst_36 = arith.constant 0.000000e+00 : f32
    %100 = vector.broadcast %cst_36 : f32 to vector<4x8x16xf32>
    %101 = arith.subf %100, %97 : vector<4x8x16xf32>
    %102 = arith.mulf %31, %101 : vector<4x8x16xf32>
    %cst_37 = arith.constant dense<0.000000e+00> : vector<8x16xf32>
    %103 = vector.multi_reduction <add>, %102, %cst_37 [0] : vector<4x8x16xf32> to vector<8x16xf32>
    %cst_38 = arith.constant 0.000000e+00 : f32
    %104 = vector.broadcast %cst_38 : f32 to vector<8x16xf32>
    %105 = arith.select %96, %99, %104 : vector<8x16xi1>, vector<8x16xf32>
    %cst_39 = arith.constant 0.000000e+00 : f32
    %106 = vector.broadcast %cst_39 : f32 to vector<8x16xf32>
    %107 = arith.select %96, %103, %106 : vector<8x16xi1>, vector<8x16xf32>
    %108 = arith.cmpi eq, %4, %37 : vector<8x16xi32>
    %cst_40 = arith.constant 1.000000e+00 : f32
    %109 = vector.broadcast %cst_40 : f32 to vector<8x16xf32>
    %110 = arith.mulf %109, %105 : vector<8x16xf32>
    %cst_41 = arith.constant 3.000000e+00 : f32
    %111 = vector.broadcast %cst_41 : f32 to vector<8x16xf32>
    %112 = arith.subf %111, %105 : vector<8x16xf32>
    %cst_42 = arith.constant 0.000000e+00 : f32
    %113 = vector.broadcast %cst_42 : f32 to vector<8x16xf32>
    %114 = arith.maximumf %112, %113 : vector<8x16xf32>
    %cst_43 = arith.constant 1.000000e+00 : f32
    %115 = vector.broadcast %cst_43 : f32 to vector<8x16xf32>
    %116 = arith.mulf %115, %114 : vector<8x16xf32>
    %117 = arith.select %108, %110, %116 : vector<8x16xi1>, vector<8x16xf32>
    %cst_44 = arith.constant 1.000000e+00 : f32
    %118 = vector.broadcast %cst_44 : f32 to vector<8x16xf32>
    %119 = arith.mulf %118, %107 : vector<8x16xf32>
    %cst_45 = arith.constant 3.000000e+00 : f32
    %120 = vector.broadcast %cst_45 : f32 to vector<8x16xf32>
    %121 = arith.subf %120, %107 : vector<8x16xf32>
    %cst_46 = arith.constant 0.000000e+00 : f32
    %122 = vector.broadcast %cst_46 : f32 to vector<8x16xf32>
    %123 = arith.maximumf %121, %122 : vector<8x16xf32>
    %cst_47 = arith.constant 1.000000e+00 : f32
    %124 = vector.broadcast %cst_47 : f32 to vector<8x16xf32>
    %125 = arith.mulf %124, %123 : vector<8x16xf32>
    %126 = arith.select %108, %119, %125 : vector<8x16xi1>, vector<8x16xf32>
    %127 = arith.addf %117, %126 : vector<8x16xf32>
    %cst_48 = arith.constant 0.000000e+00 : f32
    %128 = vector.broadcast %cst_48 : f32 to vector<8x16xf32>
    %129 = arith.select %42, %127, %128 : vector<8x16xi1>, vector<8x16xf32>
    %130 = arith.addf %92, %129 : vector<8x16xf32>
    %131 = vector.extract_strided_slice %31 {offsets = [0, 0, 1], sizes = [4, 8, 15], strides = [1, 1, 1]} : vector<4x8x16xf32> to vector<4x8x15xf32>
    %132 = vector.extract_strided_slice %31 {offsets = [0, 0, 0], sizes = [4, 8, 1], strides = [1, 1, 1]} : vector<4x8x16xf32> to vector<4x8x1xf32>
    %133 = tpu.concatenate %131, %132 in 2 : vector<4x8x15xf32>, vector<4x8x1xf32> -> vector<4x8x16xf32>
    %134 = vector.extract_strided_slice %37 {offsets = [0, 1], sizes = [8, 15], strides = [1, 1]} : vector<8x16xi32> to vector<8x15xi32>
    %135 = vector.extract_strided_slice %37 {offsets = [0, 0], sizes = [8, 1], strides = [1, 1]} : vector<8x16xi32> to vector<8x1xi32>
    %136 = tpu.concatenate %134, %135 in 1 : vector<8x15xi32>, vector<8x1xi32> -> vector<8x16xi32>
    %137 = arith.andi %42, %44 : vector<8x16xi1>
    %c255_i32_49 = arith.constant 255 : i32
    %138 = vector.broadcast %c255_i32_49 : i32 to vector<8x16xi32>
    %139 = arith.cmpi eq, %136, %138 : vector<8x16xi32>
    %140 = arith.ori %16, %139 : vector<8x16xi1>
    %cst_50 = arith.constant dense<true> : vector<8x16xi1>
    %141 = arith.xori %140, %cst_50 : vector<8x16xi1>
    %142 = arith.subf %14, %133 : vector<4x8x16xf32>
    %143 = arith.mulf %14, %142 : vector<4x8x16xf32>
    %cst_51 = arith.constant dense<0.000000e+00> : vector<8x16xf32>
    %144 = vector.multi_reduction <add>, %143, %cst_51 [0] : vector<4x8x16xf32> to vector<8x16xf32>
    %cst_52 = arith.constant 0.000000e+00 : f32
    %145 = vector.broadcast %cst_52 : f32 to vector<4x8x16xf32>
    %146 = arith.subf %145, %142 : vector<4x8x16xf32>
    %147 = arith.mulf %133, %146 : vector<4x8x16xf32>
    %cst_53 = arith.constant dense<0.000000e+00> : vector<8x16xf32>
    %148 = vector.multi_reduction <add>, %147, %cst_53 [0] : vector<4x8x16xf32> to vector<8x16xf32>
    %cst_54 = arith.constant 0.000000e+00 : f32
    %149 = vector.broadcast %cst_54 : f32 to vector<8x16xf32>
    %150 = arith.select %141, %144, %149 : vector<8x16xi1>, vector<8x16xf32>
    %cst_55 = arith.constant 0.000000e+00 : f32
    %151 = vector.broadcast %cst_55 : f32 to vector<8x16xf32>
    %152 = arith.select %141, %148, %151 : vector<8x16xi1>, vector<8x16xf32>
    %153 = arith.cmpi eq, %4, %136 : vector<8x16xi32>
    %cst_56 = arith.constant 1.000000e+00 : f32
    %154 = vector.broadcast %cst_56 : f32 to vector<8x16xf32>
    %155 = arith.mulf %154, %150 : vector<8x16xf32>
    %cst_57 = arith.constant 3.000000e+00 : f32
    %156 = vector.broadcast %cst_57 : f32 to vector<8x16xf32>
    %157 = arith.subf %156, %150 : vector<8x16xf32>
    %cst_58 = arith.constant 0.000000e+00 : f32
    %158 = vector.broadcast %cst_58 : f32 to vector<8x16xf32>
    %159 = arith.maximumf %157, %158 : vector<8x16xf32>
    %cst_59 = arith.constant 1.000000e+00 : f32
    %160 = vector.broadcast %cst_59 : f32 to vector<8x16xf32>
    %161 = arith.mulf %160, %159 : vector<8x16xf32>
    %162 = arith.select %153, %155, %161 : vector<8x16xi1>, vector<8x16xf32>
    %cst_60 = arith.constant 1.000000e+00 : f32
    %163 = vector.broadcast %cst_60 : f32 to vector<8x16xf32>
    %164 = arith.mulf %163, %152 : vector<8x16xf32>
    %cst_61 = arith.constant 3.000000e+00 : f32
    %165 = vector.broadcast %cst_61 : f32 to vector<8x16xf32>
    %166 = arith.subf %165, %152 : vector<8x16xf32>
    %cst_62 = arith.constant 0.000000e+00 : f32
    %167 = vector.broadcast %cst_62 : f32 to vector<8x16xf32>
    %168 = arith.maximumf %166, %167 : vector<8x16xf32>
    %cst_63 = arith.constant 1.000000e+00 : f32
    %169 = vector.broadcast %cst_63 : f32 to vector<8x16xf32>
    %170 = arith.mulf %169, %168 : vector<8x16xf32>
    %171 = arith.select %153, %164, %170 : vector<8x16xi1>, vector<8x16xf32>
    %172 = arith.addf %162, %171 : vector<8x16xf32>
    %cst_64 = arith.constant 0.000000e+00 : f32
    %173 = vector.broadcast %cst_64 : f32 to vector<8x16xf32>
    %174 = arith.select %137, %172, %173 : vector<8x16xi1>, vector<8x16xf32>
    %175 = arith.addf %130, %174 : vector<8x16xf32>
    %176 = vector.extract_strided_slice %31 {offsets = [0, 0, 15], sizes = [4, 8, 1], strides = [1, 1, 1]} : vector<4x8x16xf32> to vector<4x8x1xf32>
    %177 = vector.extract_strided_slice %31 {offsets = [0, 0, 0], sizes = [4, 8, 15], strides = [1, 1, 1]} : vector<4x8x16xf32> to vector<4x8x15xf32>
    %178 = tpu.concatenate %176, %177 in 2 : vector<4x8x1xf32>, vector<4x8x15xf32> -> vector<4x8x16xf32>
    %179 = vector.extract_strided_slice %37 {offsets = [0, 15], sizes = [8, 1], strides = [1, 1]} : vector<8x16xi32> to vector<8x1xi32>
    %180 = vector.extract_strided_slice %37 {offsets = [0, 0], sizes = [8, 15], strides = [1, 1]} : vector<8x16xi32> to vector<8x15xi32>
    %181 = tpu.concatenate %179, %180 in 1 : vector<8x1xi32>, vector<8x15xi32> -> vector<8x16xi32>
    %182 = arith.andi %42, %46 : vector<8x16xi1>
    %c255_i32_65 = arith.constant 255 : i32
    %183 = vector.broadcast %c255_i32_65 : i32 to vector<8x16xi32>
    %184 = arith.cmpi eq, %181, %183 : vector<8x16xi32>
    %185 = arith.ori %16, %184 : vector<8x16xi1>
    %cst_66 = arith.constant dense<true> : vector<8x16xi1>
    %186 = arith.xori %185, %cst_66 : vector<8x16xi1>
    %187 = arith.subf %14, %178 : vector<4x8x16xf32>
    %188 = arith.mulf %14, %187 : vector<4x8x16xf32>
    %cst_67 = arith.constant dense<0.000000e+00> : vector<8x16xf32>
    %189 = vector.multi_reduction <add>, %188, %cst_67 [0] : vector<4x8x16xf32> to vector<8x16xf32>
    %cst_68 = arith.constant 0.000000e+00 : f32
    %190 = vector.broadcast %cst_68 : f32 to vector<4x8x16xf32>
    %191 = arith.subf %190, %187 : vector<4x8x16xf32>
    %192 = arith.mulf %178, %191 : vector<4x8x16xf32>
    %cst_69 = arith.constant dense<0.000000e+00> : vector<8x16xf32>
    %193 = vector.multi_reduction <add>, %192, %cst_69 [0] : vector<4x8x16xf32> to vector<8x16xf32>
    %cst_70 = arith.constant 0.000000e+00 : f32
    %194 = vector.broadcast %cst_70 : f32 to vector<8x16xf32>
    %195 = arith.select %186, %189, %194 : vector<8x16xi1>, vector<8x16xf32>
    %cst_71 = arith.constant 0.000000e+00 : f32
    %196 = vector.broadcast %cst_71 : f32 to vector<8x16xf32>
    %197 = arith.select %186, %193, %196 : vector<8x16xi1>, vector<8x16xf32>
    %198 = arith.cmpi eq, %4, %181 : vector<8x16xi32>
    %cst_72 = arith.constant 1.000000e+00 : f32
    %199 = vector.broadcast %cst_72 : f32 to vector<8x16xf32>
    %200 = arith.mulf %199, %195 : vector<8x16xf32>
    %cst_73 = arith.constant 3.000000e+00 : f32
    %201 = vector.broadcast %cst_73 : f32 to vector<8x16xf32>
    %202 = arith.subf %201, %195 : vector<8x16xf32>
    %cst_74 = arith.constant 0.000000e+00 : f32
    %203 = vector.broadcast %cst_74 : f32 to vector<8x16xf32>
    %204 = arith.maximumf %202, %203 : vector<8x16xf32>
    %cst_75 = arith.constant 1.000000e+00 : f32
    %205 = vector.broadcast %cst_75 : f32 to vector<8x16xf32>
    %206 = arith.mulf %205, %204 : vector<8x16xf32>
    %207 = arith.select %198, %200, %206 : vector<8x16xi1>, vector<8x16xf32>
    %cst_76 = arith.constant 1.000000e+00 : f32
    %208 = vector.broadcast %cst_76 : f32 to vector<8x16xf32>
    %209 = arith.mulf %208, %197 : vector<8x16xf32>
    %cst_77 = arith.constant 3.000000e+00 : f32
    %210 = vector.broadcast %cst_77 : f32 to vector<8x16xf32>
    %211 = arith.subf %210, %197 : vector<8x16xf32>
    %cst_78 = arith.constant 0.000000e+00 : f32
    %212 = vector.broadcast %cst_78 : f32 to vector<8x16xf32>
    %213 = arith.maximumf %211, %212 : vector<8x16xf32>
    %cst_79 = arith.constant 1.000000e+00 : f32
    %214 = vector.broadcast %cst_79 : f32 to vector<8x16xf32>
    %215 = arith.mulf %214, %213 : vector<8x16xf32>
    %216 = arith.select %198, %209, %215 : vector<8x16xi1>, vector<8x16xf32>
    %217 = arith.addf %207, %216 : vector<8x16xf32>
    %cst_80 = arith.constant 0.000000e+00 : f32
    %218 = vector.broadcast %cst_80 : f32 to vector<8x16xf32>
    %219 = arith.select %182, %217, %218 : vector<8x16xi1>, vector<8x16xf32>
    %220 = arith.addf %175, %219 : vector<8x16xf32>
    %c0_81 = arith.constant 0 : index
    %c0_82 = arith.constant 0 : index
    %c0_83 = arith.constant 0 : index
    %221 = vector.load %arg4[%c0_81, %c0_82, %c0_83] : memref<1x8x16xf32, #tpu.memory_space<vmem>>, vector<1x8x16xf32>
    %222 = vector.shape_cast %221 : vector<1x8x16xf32> to vector<8x16xf32>
    %223 = arith.addf %222, %220 : vector<8x16xf32>
    %c0_84 = arith.constant 0 : index
    %c0_85 = arith.constant 0 : index
    %c0_86 = arith.constant 0 : index
    %224 = vector.load %arg4[%c0_84, %c0_85, %c0_86] : memref<1x8x16xf32, #tpu.memory_space<vmem>>, vector<1x8x16xf32>
    %225 = vector.shape_cast %224 : vector<1x8x16xf32> to vector<8x16xf32>
    %226 = vector.shape_cast %223 : vector<8x16xf32> to vector<1x8x16xf32>
    tpu.vector_store %arg4[%c0_84, %c0_85, %c0_86], %226 {strides = array<i32>} : memref<1x8x16xf32, #tpu.memory_space<vmem>>, vector<1x8x16xf32>,
    %c0_87 = arith.constant 0 : index
    %c0_88 = arith.constant 0 : index
    %c0_89 = arith.constant 0 : index
    %227 = vector.load %arg5[%c0_87, %c0_88, %c0_89] : memref<1x8x16xf32, #tpu.memory_space<vmem>>, vector<1x8x16xf32>
    %228 = vector.shape_cast %227 : vector<1x8x16xf32> to vector<8x16xf32>
    %229 = arith.extui %16 : vector<8x16xi1> to vector<8x16xi32>
    %230 = arith.sitofp %229 : vector<8x16xi32> to vector<8x16xf32>
    %231 = arith.addf %228, %230 : vector<8x16xf32>
    %c0_90 = arith.constant 0 : index
    %c0_91 = arith.constant 0 : index
    %c0_92 = arith.constant 0 : index
    %232 = vector.load %arg5[%c0_90, %c0_91, %c0_92] : memref<1x8x16xf32, #tpu.memory_space<vmem>>, vector<1x8x16xf32>
    %233 = vector.shape_cast %232 : vector<1x8x16xf32> to vector<8x16xf32>
    %234 = vector.shape_cast %231 : vector<8x16xf32> to vector<1x8x16xf32>
    tpu.vector_store %arg5[%c0_90, %c0_91, %c0_92], %234 {strides = array<i32>} : memref<1x8x16xf32, #tpu.memory_space<vmem>>, vector<1x8x16xf32>,
    %235 = vector.extract_strided_slice %14 {offsets = [0, 7, 0], sizes = [4, 1, 16], strides = [1, 1, 1]} : vector<4x8x16xf32> to vector<4x1x16xf32>
    %c0_93 = arith.constant 0 : index
    %c0_94 = arith.constant 0 : index
    %c0_95 = arith.constant 0 : index
    %236 = vector.load %arg6[%c0_93, %c0_94, %c0_95] : memref<4x1x16xf32, #tpu.memory_space<vmem>>, vector<4x1x16xf32>
    tpu.vector_store %arg6[%c0_93, %c0_94, %c0_95], %235 {strides = array<i32>} : memref<4x1x16xf32, #tpu.memory_space<vmem>>, vector<4x1x16xf32>,
    %237 = vector.extract_strided_slice %4 {offsets = [7, 0], sizes = [1, 16], strides = [1, 1]} : vector<8x16xi32> to vector<1x16xi32>
    %c0_96 = arith.constant 0 : index
    %c0_97 = arith.constant 0 : index
    %238 = vector.load %arg7[%c0_96, %c0_97] : memref<1x16xi32, #tpu.memory_space<vmem>>, vector<1x16xi32>
    tpu.vector_store %arg7[%c0_96, %c0_97], %237 {strides = array<i32>} : memref<1x16xi32, #tpu.memory_space<vmem>>, vector<1x16xi32>,
    return
  }
  func.func @transform_0(%arg0: i32, %arg1: i32) -> (i32, i32, i32, i32) {
    %c0_i32 = arith.constant 0 : i32
    %c0_i32_0 = arith.constant 0 : i32
    %c0_i32_1 = arith.constant 0 : i32
    return %arg0, %c0_i32, %arg1, %c0_i32_0 : i32, i32, i32, i32
  }
  func.func @transform_1(%arg0: i32, %arg1: i32) -> (i32, i32, i32) {
    %c0_i32 = arith.constant 0 : i32
    %c0_i32_0 = arith.constant 0 : i32
    return %arg0, %arg1, %c0_i32 : i32, i32, i32
  }
  func.func @transform_2(%arg0: i32, %arg1: i32) -> (i32, i32, i32) {
    %c0_i32 = arith.constant 0 : i32
    %c0_i32_0 = arith.constant 0 : i32
    %c0_i32_1 = arith.constant 0 : i32
    return %arg0, %c0_i32, %c0_i32_0 : i32, i32, i32
  }
  func.func @transform_3(%arg0: i32, %arg1: i32) -> (i32, i32, i32) {
    %c0_i32 = arith.constant 0 : i32
    %c0_i32_0 = arith.constant 0 : i32
    %c0_i32_1 = arith.constant 0 : i32
    return %arg0, %c0_i32, %c0_i32_0 : i32, i32, i32
  }
}

</mosaic_0001>

<bundles_post_ra>
// kernel: tpu_custom_call.1
= control target key start
LH: loop header
LB: loop body
LE: loop exit
PB: predicated region body
PF: predicated region fallthrough
CT: control target
= control target key end

     0   :  { %s1817_s0 = inlined_call_operand.hbm [shape: bf16[2,4,16,16], index: 0, kind: input, shape index: {}]   ;;  %s1818_s1 = inlined_call_operand.hbm [shape: s32[2,16,16], index: 1, kind: input, shape index: {}]   ;;  %s1819_s2 = inlined_call_operand.hbm [shape: f32[2,8,16], index: 2, kind: output, shape index: {0}]   ;;  %s1820_s3 = inlined_call_operand.hbm [shape: f32[2,8,16], index: 3, kind: output, shape index: {1}]  }
   0x1   :  { %1829 = sst [smem:[#allocation24_spill]] %s1817_s0 }
   0x2   :  { %9 = vsyncpa [#allocation5], 0 }
   0x3   :  { %11 = vsyncpa [#allocation5 + $0x1], 0 }
   0x4   :  { %12 = vsyncpa [#allocation8], 0 }
   0x5   :  { %14 = vsyncpa [#allocation8 + $0x1], 0 }
   0x6   :  { %15 = vsyncpa [#allocation6], 0 }
   0x7   :  { %17 = vsyncpa [#allocation6 + $0x1], 0 }
   0x8   :  { %18 = vsyncpa [#allocation11], 0 }
   0x9   :  { %20 = vsyncpa [#allocation11 + $0x1], 0  ;;  %s1271_s12 = smov 0   ;;  %s1273_s13 = smov 0  }
   0xa   :  { %s1275_s14 = smov 0   ;;  %s1277_s15 = smov 0  }
   0xb   :  { %s1279_s16 = smov 0   ;;  %s1281_s17 = smov 0  }
   0xc   :  { %s1283_s18 = smov 0   ;;  %s1285_s19 = smov 0  }
   0xd   :  { %s1287_s20 = smov 0   ;;  %s1289_s21 = smov 0  }
   0xe   :  { %s1291_s22 = smov 0  }
   0xf LB: > { %1830 = sst [smem:[#allocation16_spill]] %s1195_s12  ;;  %s848_s23 = sadd.s32 4294967295, %s1235_s22   ;;  %s1235_s22 = sphi %s1291_s22, %s26_s22   ;;  %s1231_s21 = sphi %s1289_s21, %s1865_s21   ;;  %s1227_s20 = sphi %s1287_s20, %s1864_s20   ;;  %s1223_s19 = sphi %s1285_s19, %s1863_s19   ;;  %s1219_s18 = sphi %s1283_s18, %s1862_s18   ;;  %s1215_s17 = sphi %s1281_s17, %s1855_s17   ;;  %s1211_s16 = sphi %s1279_s16, %s1861_s16   ;;  %s1207_s15 = sphi %s1277_s15, %s1860_s15   ;;  %s1203_s14 = sphi %s1275_s14, %s1853_s14   ;;  %s1199_s13 = sphi %s1273_s13, %s1859_s13   ;;  %s1195_s12 = sphi %s1271_s12, %s1858_s12  }
  0x10   : > { %1831 = sst [smem:[#allocation17_spill]] %s1203_s14  ;;  %s849_s24 = sadd.s32 4294967294, %s1235_s22  }
  0x11   : > { %1832 = sst [smem:[#allocation18_spill]] %s1215_s17  ;;  %s35_s25 = sadd.s32 1, %s1227_s20 }
  0x12   : > { %s38_s26 = sadd.s32 1, %s1231_s21  ;;  %p36_p0 = scmp.ge.s32.totalorder %s35_s25, 2 }
  0x13   : > { %s47_s27 = sadd.s32 1, %s1215_s17  ;;  %p54_p1 = scmp.ne.s32.totalorder %s1215_s17, %s1211_s16 }
  0x14   : > { %p55_p2 = scmp.eq.s32.totalorder %s1235_s22, 0  ;;  %s1867_s25 = smov (%p36_p0, %s35_s25), 0 }
  0x15   : > { %1833 = sst [smem:[#allocation19_spill]] %s1867_s25  ;;  %s1869_s26 = smov (!%p36_p0, %s38_s26), %s1231_s21 }
  0x16   : > { %s43_s28 = ssub.s32 %s1227_s20, %s1867_s25  ;;  %p1337_p3 = por %p55_p2, %p54_p1 }
  0x17   : > { %p40_p4 = scmp.ge.s32.totalorder %s1869_s26, 2  ;;  %p60_p5 = scmp.ne.s32.totalorder %s1211_s16, %s1207_s15 }
  0x18   : > { %p61_p6 = scmp.eq.s32.totalorder %s848_s23, 0  ;;  %s101_s30 = sadd.s32 1, %s1203_s14 }
  0x19   : > { %s1871_s26 = smov (%p40_p4, %s1869_s26), 0  ;;  %p111_p8 = scmp.ne.s32.totalorder %s1203_s14, %s1199_s13 }
  0x1a   : > { %1835 = sst [smem:[#allocation20_spill]] %s1871_s26  ;;  %p1345_p7 = por %p61_p6, %p60_p5 }
  0x1b   : > { %s42_s5 = ssub.s32 %s1231_s21, %s1871_s26  ;;  %p112_p9 = scmp.eq.s32.totalorder %s848_s23, 3 }
  0x1c   : > { %s1836_s4 = scalar_select %p1345_p7, 1, 0 }
  0x1d   : > { %s44_s6 = sor.u32 %s43_s28, %s42_s5  ;;  %p99_p10 = scmp.eq.s32.totalorder %s42_s5, 0 }
  0x1e   : > { %p45_p11 = scmp.eq.s32.totalorder %s44_s6, 0  ;;  %p1353_p12 = por %p112_p9, %p111_p8 }
  0x1f   : > { %s1358_s8 = scalar_select %p99_p10, %s1203_s14, %s101_s30  }
  0x20   : > { %s1837_s7 = scalar_select %p1353_p12, 1, 0 }
  0x21   : > { %1838 = sst [smem:[#allocation21_spill]] %s1358_s8  ;;  %p117_p13 = scmp.ne.s32.totalorder %s1199_s13, %s1195_s12 }
  0x22   : > { %s1361_s9 = scalar_select %p45_p11, %s1215_s17, %s47_s27  }
  0x23   : > { %p118_p0 = scmp.eq.s32.totalorder %s849_s24, 3  ;;  %p907_p1 = scmp.lt.s32.totalorder %s1235_s22, 4 }
  0x24   : > { %1839 = sst [smem:[#allocation22_spill]] %s1361_s9  ;;  %s1371_s11 = sand.u32 1, %s1215_s17  }
  0x25   : > { %p1366_p2 = por %p118_p0, %p117_p13  ;;  %s852_s15 = sshll.u32 %s1371_s11, 4 }
  0x26   : > { %s853_s23 = sshll.u32 %s1231_s21, 3  ;;  %s168_s5 = scalar_lea.vmem [#allocation4], %s852_s15 }
  0x27   : > { %s1840_s10 = scalar_select %p1366_p2, 1, 0 }
  0x28   : > { %s173_s28 = sadd.s32 %s1227_s20, %s853_s23  ;;  %s176_s6 = sshll.u32 %s168_s5, 4  ;;  %s1376_s6 = int_to_ptr.vmem [resolvable:$true] %s176_s6 }
  0x29   : > { %1841 = sst [smem:[#allocation23_spill]] %s1840_s10  ;;  %s854_s30 = sshll.u32 %s173_s28, 6 }
  0x2a   : > { %s1842_s0 = sld [smem:[#allocation24_spill]]  ;;  %p1385_p4 = pnand %p907_p1, %p1337_p3 }
  0x2b   : > { %s165_s15 = scalar_lea.sflag [#allocation5], %s1371_s11 }
  0x2c   : > { %p1019_p6 = pneg %p1385_p4 }
  0x30   : > { %s1381_s24 = scalar_lea.hbm %s1842_s0, %s854_s30  ;;  %s1022_s28 = scalar_lea.hbm %s1842_s0, 1024 }
  0x31   : > { %s1017_s23 = scalar_lea.hbm %s1381_s24, 256  ;;  %p1023_p3 = scmp.lt.u32.totalorder %s1381_s24, %s1842_s0 }
  0x32   : > { %p1018_p5 = scmp.ne.s32.totalorder %s1381_s24, %s1017_s23  ;;  %p1024_p10 = scmp.lt.u32.totalorder %s1022_s28, %s1017_s23 }
  0x33   : > { %p1026_p13 = scmp.lt.u32.totalorder %s1017_s23, %s1381_s24 }
  0x34   : > { %p1020_p8 = pnand %p1019_p6, %p1018_p5  ;;  %p1025_p11 = por %p1024_p10, %p1023_p3 }
  0x36   : > { %p1021_p9 = pneg %p1020_p8  ;;  %p1027_p0 = por %p1026_p13, %p1025_p11 }
  0x38   : > { %p1028_p1 = pnand %p1027_p0, %p1021_p9 }
  0x3a   : > { %1031 = shalt.err (!%p1028_p1)
}
  0x3b   : > { %s1032_s27 = scalar_lea.vmem %s1376_s6, 256  ;;  %s1237_s26 = smov [#allocation4]  }
  0x3c   : > { %p1033_p5 = scmp.ne.s32.totalorder %s1376_s6, %s1032_s27  ;;  %s1037_s29 = sshll.u32 %s1237_s26, 4  ;;  %s1038_s29 = int_to_ptr.vmem [resolvable:$false] %s1037_s29 }
  0x3d   : > { %s1039_s5 = scalar_lea.vmem %s1038_s29, 512  ;;  %p1040_p12 = scmp.lt.s32.totalorder %s1376_s6, %s1038_s29 }
  0x3e   : > { %p1035_p8 = pnand %p1033_p5, %p1019_p6  ;;  %p1041_p3 = scmp.lt.s32.totalorder %s1039_s5, %s1032_s27 }
  0x40   : > { %p1036_p2 = pneg %p1035_p8  ;;  %p1042_p10 = por %p1041_p3, %p1040_p12 }
  0x42   : > { %p1043_p11 = pnand %p1042_p10, %p1036_p2 }
  0x44   : > { %1046 = shalt.err (!%p1043_p11)
}
  0x45   : > { %s1238_s23 = smov 128   ;;  %s1239_s28 = smov 64  }
  0x46   : > { %s1240_s30 = smov 4   ;;  %p858_p12 = scmp.ge.s32.totalorder %s1235_s22, 1 }
  0x47   : > { %896 = dma.hbm_to_vmem [thread:$0]  (!%p1385_p4), %s1381_s24, 256, %s1376_s6, %s165_s15, %s1238_s23, %s1239_s28, %s1240_s30  }
  0x48   : > { %p204_p2 = scmp.lt.s32.totalorder %s1235_s22, 5  ;;  %s855_s27 = sshll.u32 %s1371_s11, 3 }
  0x49   : > { %s856_s29 = sshll.u32 %s1231_s21, 1  ;;  %s190_s5 = scalar_lea.vmem [#allocation7], %s855_s27 }
  0x4a   : > { %p1420_p9 = pnand %p858_p12, %p204_p2  ;;  %s199_s0 = sshll.u32 %s190_s5, 4  ;;  %s1426_s0 = int_to_ptr.vmem [resolvable:$true] %s199_s0 }
  0x4b   : > { %s195_s9 = sadd.s32 %s1227_s20, %s856_s29  ;;  %s187_s12 = scalar_lea.sflag [#allocation8], %s1371_s11 }
  0x4c   : > { %s857_s17 = sshll.u32 %s195_s9, 7  ;;  %s1052_s23 = scalar_lea.hbm %s1818_s1, 512 }
  0x4d   : > { %s197_s10 = scalar_lea.hbm %s1818_s1, %s857_s17 }
  0x4e   : > { %s1047_s6 = scalar_lea.hbm %s197_s10, 128  ;;  %p1053_p5 = scmp.lt.u32.totalorder %s197_s10, %s1818_s1 }
  0x4f   : > { %p1048_p13 = scmp.ne.s32.totalorder %s197_s10, %s1047_s6  ;;  %p1054_p8 = scmp.lt.u32.totalorder %s1052_s23, %s1047_s6 }
  0x50   : > { %p1056_p10 = scmp.lt.u32.totalorder %s1047_s6, %s197_s10 }
  0x51   : > { %p1050_p0 = pnand %p1048_p13, %p1019_p6  ;;  %p1055_p3 = por %p1054_p8, %p1053_p5 }
  0x53   : > { %p1051_p1 = pneg %p1050_p0  ;;  %p1057_p11 = por %p1056_p10, %p1055_p3 }
  0x55   : > { %p1058_p12 = pnand %p1057_p11, %p1051_p1 }
  0x57   : > { %1061 = shalt.err (!%p1058_p12)
}
  0x58   : > { %s1062_s14 = scalar_lea.vmem %s1426_s0, 128  ;;  %s1241_s17 = smov [#allocation7]  }
  0x59   : > { %p1063_p2 = scmp.ne.s32.totalorder %s1426_s0, %s1062_s14  ;;  %s1067_s8 = sshll.u32 %s1241_s17, 4  ;;  %s1068_s8 = int_to_ptr.vmem [resolvable:$false] %s1067_s8 }
  0x5a   : > { %s1069_s9 = scalar_lea.vmem %s1068_s8, 256  ;;  %p1070_p7 = scmp.lt.s32.totalorder %s1426_s0, %s1068_s8 }
  0x5b   : > { %p1065_p13 = pnand %p1063_p2, %p1019_p6  ;;  %p1071_p5 = scmp.lt.s32.totalorder %s1069_s9, %s1062_s14 }
  0x5d   : > { %p1066_p0 = pneg %p1065_p13  ;;  %p1072_p8 = por %p1071_p5, %p1070_p7 }
  0x5f   : > { %p1073_p3 = pnand %p1072_p8, %p1066_p0 }
  0x61   : > { %1076 = shalt.err (!%p1073_p3)
}
  0x62   : > { %899 = dma.hbm_to_vmem [thread:$0]  (!%p1385_p4), %s197_s10, 128, %s1426_s0, %s187_s12  }
  0x63   : > { %208 = sbr.rel (%p1420_p9) target bundleno = 362 (0x16a), region = 28  ;;  %s210_s11 = sand.u32 (!%p1420_p9), 1, %s1211_s16  }
  0x64   : > { %s859_s27 = sshll.u32 (!%p1420_p9), %s210_s11, 4  ;;  %s211_s29 = scalar_lea.sflag (!%p1420_p9), [#allocation5], %s210_s11 }
  0x65   : > { %s214_s5 = scalar_lea.vmem (!%p1420_p9), [#allocation4], %s859_s27  ;;  %p1845_p6 = scmp.ne.s32.totalorder (!%p1420_p9), %s1836_s4, 0 }
  0x6a   : > { %1178 = dma.done.wait (%p1845_p6), %s211_s29, 256  }
  0x6b   : > { %1180 = vsyncadd (%p1845_p6), %s211_s29, 4294967040  ;;  %s860_s6 = sshll.u32 %s210_s11, 3  ;;  %s220_s24 = scalar_lea.sflag [#allocation8], %s210_s11 }
  0x6c   : > { %s223_s25 = scalar_lea.vmem [#allocation7], %s860_s6 }
  0x6d   : > { %1182 = dma.done.wait (%p1845_p6), %s220_s24, 128  }
  0x6e   : > { %1184 = vsyncadd (%p1845_p6), %s220_s24, 4294967168  ;;  %s1462_s0 = sand.u32 1, %s1199_s13   ;;  %v303_v0 = vlaneseq  ;;  %p363_p7 = scmp.gt.s32.totalorder %s1219_s18, 0  ;;  %v877_v4 = vld [vmem:[%s214_s5] sm:$0xff]   ;;  %v884_v5 = vld [vmem:[%s214_s5 + $0x8] sm:$0xff]   ;;  %vm265_vm4 = vcmask 130048  }
  0x6f   : > { %s861_s12 = sshll.u32 %s1462_s0, 3  ;;  %v1473_v6 = vld [vmem:[%s223_s25] sm:$0xff]  ;;  %v878_v7 = vunpack.c.l.bf16 %v877_v4  ;;  %v879_v8 = vunpack.c.h.bf16 %v877_v4  ;;  %v882_v9 = vunpack.c.l.bf16 %v884_v5  ;;  %v883_v10 = vunpack.c.h.bf16 %v884_v5  ;;  %v867_v11 = vld [vmem:[#allocation3] ss:$0 sm:$0xff]  ;;  %v863_v46 = vld [vmem:[#allocation2] ss:$0 sm:$0xff] }
  0x70   : > { %v1466_v1 = vshrl.u32 %v303_v0, 7  ;;  %v1468_v2 = vand.u32 127, %v303_v0  ;;  %s364_s10 = scalar_select %p363_p7, 1, 0  ;;  %vm297_vm6 = vcmp.eq.s32.totalorder %v1473_v6, 255  ;;  %v355_v12 = vrot.slane %v1473_v6, 7 }
  0x71   : > { %v266_v14 = vsel %vm265_vm4, %v878_v7, -inf  ;;  %v267_v15 = vsel %vm265_vm4, %v879_v8, -inf  ;;  %v268_v16 = vsel %vm265_vm4, %v882_v9, -inf  ;;  %v269_v17 = vsel %vm265_vm4, %v883_v10, -inf  ;;  %v864_v47 = vld [vmem:[#allocation2 + $0x1] ss:$0 sm:$0xff] }
  0x72   : > { %vm368_vm0 = vcmp.lt.s32.totalorder %v1468_v2, 15  ;;  %vm369_vm1 = vcmp.gt.s32.totalorder %v1468_v2, 0  ;;  %v365_v3 = vstv %s364_s10  ;;  %vm362_vm2 = vcmp.gt.s32.totalorder %v1466_v1, 0  ;;  %v865_v48 = vld [vmem:[#allocation2 + $0x2] ss:$0 sm:$0xff]  ;;  %s1524_s4 = scalar_lea.vmem [#allocation9], %s861_s12 }
  0x73   : > { %vm366_vm3 = vcmp.eq.s32.totalorder %v365_v3, 1  ;;  %vm307_vm5 = vcmp.eq.s32.totalorder %v1466_v1, 0  ;;  %v270_v18 = vmax.f32 %v266_v14, %v267_v15  ;;  %v271_v19 = vmax.f32 %v268_v16, %v269_v17  ;;  %v866_v49 = vld [vmem:[#allocation2 + $0x3] ss:$0 sm:$0xff]  ;;  %s1528_s26 = scalar_lea.vmem [#allocation10], %s861_s12  ;;  %p868_p4 = scmp.ne.s32.totalorder %s1219_s18, 0 }
  0x74   : > { %vm1478_vm7 = vmor %vm362_vm2, %vm366_vm3  ;;  %v1488_v20 = vsel %vm307_vm5, %v867_v11, %v355_v12  ;;  %v1242_v58 = vmov (!%p868_p4), 0.0  }
  0x75   : > { %v272_v21 = vmax.f32 %v270_v18, %v271_v19  ;;  %374 = vst.msk [vmem:[%s1524_s4] sm:$0xff] (!%p868_p4), %vm265_vm4, %v1242_v58  ;;  %375 = vst.msk [vmem:[%s1528_s26] sm:$0xff] (!%p868_p4), %vm265_vm4, %v1242_v58 }
  0x77   : > { %v273_v22 = vsub.f32 %v878_v7, %v272_v21  ;;  %v274_v23 = vsub.f32 %v879_v8, %v272_v21  ;;  %v275_v24 = vsub.f32 %v882_v9, %v272_v21  ;;  %v276_v25 = vsub.f32 %v883_v10, %v272_v21 }
  0x79   : > { %v277_v26 = vmul.f32 1.442695, %v273_v22  ;;  %v279_v27 = vmul.f32 1.442695, %v274_v23  ;;  %v281_v28 = vmul.f32 1.442695, %v275_v24 }
  0x7a   : > { %v283_v29 = vmul.f32 1.442695, %v276_v25 }
  0x7b   : > { %1007 = vpow2.f32 %v277_v26 }
  0x7c   : > { %1009 = vpow2.f32 %v279_v27 }
  0x7d   : > { %1011 = vpow2.f32 %v281_v28 }
  0x7e   : > { %1013 = vpow2.f32 %v283_v29 }
  0x85   : > { %v1008_v30 = vpop.eup %1007 }
  0x86   : > { %v1010_v31 = vpop.eup %1009  ;;  %v285_v32 = vsel %vm265_vm4, %v1008_v30, 0.0 }
  0x87   : > { %v1012_v33 = vpop.eup %1011  ;;  %v286_v34 = vsel %vm265_vm4, %v1010_v31, 0.0 }
  0x88   : > { %v1014_v35 = vpop.eup %1013  ;;  %v287_v36 = vadd.f32 %v286_v34, %v285_v32  ;;  %v288_v37 = vsel %vm265_vm4, %v1012_v33, 0.0 }
  0x89   : > { %v290_v38 = vsel %vm265_vm4, %v1014_v35, 0.0 }
  0x8a   : > { %v289_v39 = vadd.f32 %v288_v37, %v287_v36 }
  0x8c   : > { %v291_v40 = vadd.f32 %v290_v38, %v289_v39 }
  0x8e   : > { %1015 = vrcp.f32 %v291_v40 }
  0x97   : > { %373 = sbr.rel (%p868_p4) target bundleno = 158 (0x9e), region = 40 }
  0x98   : > { %v1016_v41 = vpop.eup %1015 }
  0x99   : > { %v1494_v42 = vmul.f32 %v1016_v41, %v1008_v30  ;;  %v1496_v43 = vmul.f32 %v1016_v41, %v1010_v31  ;;  %v1498_v44 = vmul.f32 %v1016_v41, %v1012_v33  ;;  %v1500_v45 = vmul.f32 %v1016_v41, %v1014_v35 }
  0x9b   : > { %v312_v50 = vrot.slane %v1494_v42, 7  ;;  %v313_v51 = vrot.slane %v1496_v43, 7  ;;  %v314_v52 = vrot.slane %v1498_v44, 7  ;;  %v315_v53 = vrot.slane %v1500_v45, 7 }
  0x9d   : > { %v1508_v54 = vsel %vm307_vm5, %v863_v46, %v312_v50  ;;  %v1512_v55 = vsel %vm307_vm5, %v864_v47, %v313_v51  ;;  %v1516_v56 = vsel %vm307_vm5, %v865_v48, %v314_v52  ;;  %v1520_v57 = vsel %vm307_vm5, %v866_v49, %v315_v53 }
  0x9e PF: > { %s1243_s15 = smov 15   ;;  %s1244_s23 = smov 127   ;;  %v665_v59 = vld [vmem:[%s1528_s26] sm:$0xff]  ;;  %v1247_v60 = vmov 0.0   ;;  %vm670_vm8 = vcmask 130055  }
  0x9f   : > { %388 = vrot.lane.b32.xlu1 %v1494_v42, %s1243_s15  ;;  %376 = vrot.lane.b32.xlu0 %v1494_v42, %s1244_s23  ;;  %s1245_s18 = smov 113   ;;  %s1246_s28 = smov 1   ;;  %v869_v61 = vsel %vm297_vm6, 1.0, %v1247_v60  ;;  %671 = vst.msk [vmem:[#allocation2 - $0x7] sm:$0x80] %vm670_vm8, %v1494_v42 }
  0xa0   : > { %v668_v62 = vadd.f32 %v869_v61, %v665_v59  ;;  %s872_s30 = sshll.u32 %s1223_s19, 7  ;;  %672 = vst.msk [vmem:[#allocation2 - $0x6] sm:$0x80] %vm670_vm8, %v1496_v43  ;;  %673 = vst.msk [vmem:[#allocation2 - $0x5] sm:$0x80] %vm670_vm8, %v1498_v44  ;;  %s708_s9 = sshll.u32 %s1528_s26, 4  ;;  %s709_s9 = int_to_ptr.vmem [resolvable:$true] %s708_s9 }
  0xa1   : > { %674 = vst.msk [vmem:[#allocation2 - $0x4] sm:$0x80] %vm670_vm8, %v1500_v45  ;;  %675 = vst.msk [vmem:[#allocation3 - $0x7] sm:$0x80] %vm670_vm8, %v1473_v6  ;;  %s1591_s8 = scalar_lea.hbm %s1820_s3, %s872_s30  ;;  %s682_s11 = scalar_lea.sflag [#allocation11], %s1462_s0 }
  0xa2   : > { %669 = vst.msk [vmem:[%s1528_s26] sm:$0xff] %vm265_vm4, %v668_v62  ;;  %s1077_s27 = scalar_lea.vmem %s709_s9, 128  ;;  %p1848_p1 = scmp.ne.s32.totalorder %s1837_s7, 0 }
  0xa3   : > { %390 = vrot.lane.b32.xlu1 %v1496_v43, %s1243_s15  ;;  %378 = vrot.lane.b32.xlu0 %v1496_v43, %s1244_s23  ;;  %p1078_p9 = scmp.ne.s32.totalorder %s709_s9, %s1077_s27  ;;  %s1248_s29 = smov [#allocation10]  }
  0xa4   : > { %s1081_s5 = sshll.u32 %s1248_s29, 4  ;;  %s1082_s5 = int_to_ptr.vmem [resolvable:$false] %s1081_s5 }
  0xa5   : > { %p1079_p10 = pnand %p1078_p9, %p1848_p1  ;;  %s1083_s6 = scalar_lea.vmem %s1082_s5, 256 }
  0xa6   : > { %p1084_p12 = scmp.lt.s32.totalorder %s709_s9, %s1082_s5  ;;  %p1085_p2 = scmp.lt.s32.totalorder %s1083_s6, %s1077_s27 }
  0xa7   : > { %392 = vrot.lane.b32.xlu1 %v1498_v44, %s1243_s15  ;;  %380 = vrot.lane.b32.xlu0 %v1498_v44, %s1244_s23  ;;  %p1080_p11 = pneg %p1079_p10 }
  0xa8   : > { %p1086_p13 = por %p1085_p2, %p1084_p12 }
  0xaa   : > { %p1087_p0 = pnand %p1086_p13, %p1080_p11 }
  0xab   : > { %505 = vrot.lane.b32.xlu1 %v1512_v55, %s1244_s23  ;;  %503 = vrot.lane.b32.xlu0 %v1508_v54, %s1244_s23 }
  0xaf   : > { %517 = vrot.lane.b32.xlu1 %v1512_v55, %s1243_s15  ;;  %515 = vrot.lane.b32.xlu0 %v1508_v54, %s1243_s15 }
  0xb3   : > { %394 = vrot.lane.b32.xlu1 %v1500_v45, %s1243_s15  ;;  %382 = vrot.lane.b32.xlu0 %v1500_v45, %s1244_s23 }
  0xb7   : > { %519 = vrot.lane.b32.xlu1 %v1516_v56, %s1243_s15  ;;  %507 = vrot.lane.b32.xlu0 %v1516_v56, %s1244_s23 }
  0xbb   : > { %584 = vrot.lane.b32.xlu1 %v1512_v55, %s1245_s18  ;;  %582 = vrot.lane.b32.xlu0 %v1508_v54, %s1245_s18 }
  0xbf   : > { %596 = vrot.lane.b32.xlu1 %v1512_v55, %s1246_s28  ;;  %594 = vrot.lane.b32.xlu0 %v1508_v54, %s1246_s28 }
  0xc3   : > { %521 = vrot.lane.b32.xlu1 %v1520_v57, %s1243_s15  ;;  %509 = vrot.lane.b32.xlu0 %v1520_v57, %s1244_s23 }
  0xc7   : > { %598 = vrot.lane.b32.xlu1 %v1516_v56, %s1246_s28  ;;  %586 = vrot.lane.b32.xlu0 %v1516_v56, %s1245_s18 }
  0xcb   : > { %600 = vrot.lane.b32.xlu1 %v1520_v57, %s1246_s28  ;;  %588 = vrot.lane.b32.xlu0 %v1520_v57, %s1245_s18 }
  0xcf   : > { %407 = vrot.lane.b32.xlu1 %v1473_v6, %s1243_s15  ;;  %405 = vrot.lane.b32.xlu0 %v1473_v6, %s1244_s23 }
  0xd3   : > { %533 = vrot.lane.b32.xlu1 %v1488_v20, %s1243_s15  ;;  %531 = vrot.lane.b32.xlu0 %v1488_v20, %s1244_s23 }
  0xd7   : > { %613 = vrot.lane.b32.xlu1 %v1488_v20, %s1246_s28  ;;  %611 = vrot.lane.b32.xlu0 %v1488_v20, %s1245_s18 }
  0xd8   : > { %1090 = shalt.err (!%p1087_p0)
}
  0xd9   : > { %s1091_s24 = scalar_lea.hbm %s1591_s8, 128  ;;  %s1095_s10 = scalar_lea.hbm %s1820_s3, 256 }
  0xda   : > { %p1092_p5 = scmp.ne.s32.totalorder %s1591_s8, %s1091_s24  ;;  %p1096_p6 = scmp.lt.u32.totalorder %s1591_s8, %s1820_s3 }
  0xdb   : > { %p1097_p7 = scmp.lt.u32.totalorder %s1095_s10, %s1091_s24  ;;  %p1099_p9 = scmp.lt.u32.totalorder %s1091_s24, %s1591_s8 }
  0xdc   : > { %p1093_p8 = pnand %p1092_p5, %p1848_p1 }
  0xdd   : > { %p1098_p4 = por %p1097_p7, %p1096_p6 }
  0xde   : > { %p1094_p3 = pneg %p1093_p8 }
  0xdf   : > { %p1100_p10 = por %p1099_p9, %p1098_p4 }
  0xe1   : > { %p1101_p11 = pnand %p1100_p10, %p1094_p3 }
  0xe3   : > { %1104 = shalt.err (!%p1101_p11)
}
  0xe4   : > { %890 = dma.vmem_to_hbm [thread:$0]  (%p1848_p1), %s709_s9, 128, %s1591_s8, %s682_s11   ;;  %v457_v63 = vsub.f32 %v1494_v42, %v1508_v54  ;;  %v458_v0 = vsub.f32 %v1496_v43, %v1512_v55  ;;  %v459_v4 = vsub.f32 %v1498_v44, %v1516_v56  ;;  %v460_v12 = vsub.f32 %v1500_v45, %v1520_v57 }
  0xe5   : > { %vm454_vm9 = vcmp.eq.s32.totalorder %v1488_v20, 255  ;;  %vm400_vm11 = vcmask 121856   ;;  %vm1249_vm12 = vmmov 1   ;;  %vm489_vm14 = vcmp.eq.s32.totalorder %v1473_v6, %v1488_v20  ;;  %s695_s23 = sshll.u32 %s1524_s4, 4  ;;  %s1752_s14 = scalar_lea.hbm %s1819_s2, %s872_s30  ;;  %s1754_s23 = int_to_ptr.vmem [resolvable:$true] %s695_s23 }
  0xe6   : > { %v472_v5 = vsub.f32 0.0, %v457_v63  ;;  %v473_v7 = vsub.f32 0.0, %v458_v0  ;;  %v461_v10 = vmul.f32 %v457_v63, %v1494_v42  ;;  %v462_v11 = vmul.f32 %v458_v0, %v1496_v43  ;;  %vm455_vm10 = vmor %vm297_vm6, %vm454_vm9  ;;  %s677_s17 = scalar_lea.sflag [#allocation6], %s1462_s0  ;;  %s1105_s8 = scalar_lea.vmem %s1754_s23, 128 }
  0xe7   : > { %v474_v14 = vsub.f32 0.0, %v459_v4  ;;  %v463_v19 = vmul.f32 %v459_v4, %v1498_v44  ;;  %v475_v23 = vsub.f32 0.0, %v460_v12  ;;  %v464_v30 = vmul.f32 %v460_v12, %v1500_v45  ;;  %vm456_vm13 = vmxor %vm455_vm10, %vm1249_vm12  ;;  %p1106_p12 = scmp.ne.s32.totalorder %s1754_s23, %s1105_s8  ;;  %s1250_s9 = smov [#allocation9]  }
  0xe8   : > { %v476_v15 = vmul.f32 %v472_v5, %v1508_v54  ;;  %v477_v16 = vmul.f32 %v473_v7, %v1512_v55  ;;  %v465_v21 = vsel %vm265_vm4, %v461_v10, 0.0  ;;  %v466_v22 = vsel %vm265_vm4, %v462_v11, 0.0  ;;  %s1109_s19 = sshll.u32 %s1250_s9, 4  ;;  %s1110_s19 = int_to_ptr.vmem [resolvable:$false] %s1109_s19 }
  0xe9   : > { %v467_v24 = vadd.f32 %v466_v22, %v465_v21  ;;  %v478_v25 = vmul.f32 %v474_v14, %v1516_v56  ;;  %v468_v31 = vsel %vm265_vm4, %v463_v19, 0.0  ;;  %v479_v34 = vmul.f32 %v475_v23, %v1520_v57  ;;  %p1107_p2 = pnand %p1106_p12, %p1848_p1  ;;  %s1111_s11 = scalar_lea.vmem %s1110_s19, 256 }
  0xea   : > { %v480_v26 = vsel %vm265_vm4, %v476_v15, 0.0  ;;  %v481_v27 = vsel %vm265_vm4, %v477_v16, 0.0  ;;  %v470_v38 = vsel %vm265_vm4, %v464_v30, 0.0  ;;  %vm606_vm15 = vcmask 7168   ;;  %p1112_p0 = scmp.lt.s32.totalorder %s1754_s23, %s1110_s19  ;;  %p1113_p5 = scmp.lt.s32.totalorder %s1111_s11, %s1105_s8 }
  0xeb   : > { %v482_v32 = vadd.f32 %v481_v27, %v480_v26  ;;  %v469_v33 = vadd.f32 %v468_v31, %v467_v24  ;;  %v483_v35 = vsel %vm265_vm4, %v478_v25, 0.0  ;;  %v485_v41 = vsel %vm265_vm4, %v479_v34, 0.0  ;;  %p1108_p13 = pneg %p1107_p2 }
  0xec   : > { %p1114_p8 = por %p1113_p5, %p1112_p0 }
  0xed   : > { %v484_v39 = vadd.f32 %v483_v35, %v482_v32  ;;  %v471_v40 = vadd.f32 %v470_v38, %v469_v33 }
  0xee   : > { %p1115_p3 = pnand %p1114_p8, %p1108_p13 }
  0xef   : > { %v486_v49 = vadd.f32 %v485_v41, %v484_v39  ;;  %v487_v52 = vsel %vm456_vm13, %v471_v40, 0.0 }
  0xf0   : > { %v490_v59 = vsub.f32 3.0, %v487_v52 }
  0xf1   : > { %v1646_v58 = vsel %vm456_vm13, %v486_v49, 0.0 }
  0xf2   : > { %v491_v7 = vmax.f32 %v490_v59, 0.0 }
  0xf4   : > { %v1669_v27 = vsel %vm489_vm14, %v487_v52, %v491_v7 }
 0x111   : > { %v389_v1 = vpop.permute.xlu1 %388  ;;  %v377_v3 = vpop.permute.xlu0 %376 }
 0x112   : > { %v401_v50 = vsel %vm400_vm11, %v377_v3, %v389_v1  ;;  %v493_v3 = vsub.f32 3.0, %v1646_v58 }
 0x113   : > { %v413_v56 = vsub.f32 %v1494_v42, %v401_v50 }
 0x115   : > { %v391_v8 = vpop.permute.xlu1 %390  ;;  %v379_v9 = vpop.permute.xlu0 %378  ;;  %v428_v4 = vsub.f32 0.0, %v413_v56  ;;  %v417_v16 = vmul.f32 %v413_v56, %v1494_v42 }
 0x116   : > { %v402_v46 = vsel %vm400_vm11, %v379_v9, %v391_v8 }
 0x117   : > { %v414_v51 = vsub.f32 %v1496_v43, %v402_v46  ;;  %v432_v19 = vmul.f32 %v428_v4, %v401_v50  ;;  %v421_v34 = vsel %vm265_vm4, %v417_v16, 0.0 }
 0x119   : > { %v393_v17 = vpop.permute.xlu1 %392  ;;  %v381_v18 = vpop.permute.xlu0 %380  ;;  %v429_v60 = vsub.f32 0.0, %v414_v51  ;;  %v418_v8 = vmul.f32 %v414_v51, %v1496_v43  ;;  %v436_v38 = vsel %vm265_vm4, %v432_v19, 0.0 }
 0x11a   : > { %v403_v55 = vsel %vm400_vm11, %v381_v18, %v393_v17  ;;  %v1659_v18 = vmax.f32 %v493_v3, 0.0 }
 0x11b   : > { %v415_v62 = vsub.f32 %v1498_v44, %v403_v55  ;;  %v433_v9 = vmul.f32 %v429_v60, %v402_v46  ;;  %v422_v24 = vsel %vm265_vm4, %v418_v8, 0.0 }
 0x11c   : > { %v423_v46 = vadd.f32 %v422_v24, %v421_v34 }
 0x11d   : > { %v506_v28 = vpop.permute.xlu1 %505  ;;  %v504_v29 = vpop.permute.xlu0 %503  ;;  %v430_v12 = vsub.f32 0.0, %v415_v62  ;;  %v437_v25 = vsel %vm265_vm4, %v433_v9, 0.0  ;;  %v419_v26 = vmul.f32 %v415_v62, %v1498_v44 }
 0x11f   : > { %v424_v50 = vsel %vm265_vm4, %v419_v26, 0.0 }
 0x120   : > { %v425_v7 = vadd.f32 %v424_v50, %v423_v46 }
 0x121   : > { %v518_v36 = vpop.permute.xlu1 %517  ;;  %v516_v37 = vpop.permute.xlu0 %515 }
 0x122   : > { %v528_v57 = vsel %vm400_vm11, %v506_v28, %v518_v36  ;;  %v527_v61 = vsel %vm400_vm11, %v504_v29, %v516_v37  ;;  %v434_v28 = vmul.f32 %v430_v12, %v403_v55 }
 0x123   : > { %v541_v1 = vsub.f32 %v1496_v43, %v528_v57  ;;  %v540_v5 = vsub.f32 %v1494_v42, %v527_v61 }
 0x124   : > { %v439_v51 = vsel %vm265_vm4, %v434_v28, 0.0 }
 0x125   : > { %v395_v47 = vpop.permute.xlu1 %394  ;;  %v383_v48 = vpop.permute.xlu0 %382  ;;  %v556_v17 = vsub.f32 0.0, %v541_v1  ;;  %v555_v21 = vsub.f32 0.0, %v540_v5  ;;  %v545_v29 = vmul.f32 %v541_v1, %v1496_v43  ;;  %v544_v36 = vmul.f32 %v540_v5, %v1494_v42 }
 0x126   : > { %v404_v10 = vsel %vm400_vm11, %v383_v48, %v395_v47  ;;  %v438_v47 = vadd.f32 %v437_v25, %v436_v38  ;;  %v495_v38 = vsel %vm489_vm14, %v1646_v58, %v1659_v18 }
 0x127   : > { %v416_v22 = vsub.f32 %v1500_v45, %v404_v10  ;;  %v560_v35 = vmul.f32 %v556_v17, %v528_v57  ;;  %v559_v39 = vmul.f32 %v555_v21, %v527_v61  ;;  %v549_v52 = vsel %vm265_vm4, %v545_v29, 0.0 }
 0x128   : > { %v548_v57 = vsel %vm265_vm4, %v544_v36, 0.0  ;;  %v440_v8 = vadd.f32 %v439_v51, %v438_v47 }
 0x129   : > { %v520_v53 = vpop.permute.xlu1 %519  ;;  %v508_v54 = vpop.permute.xlu0 %507  ;;  %v431_v40 = vsub.f32 0.0, %v416_v22  ;;  %v564_v56 = vsel %vm265_vm4, %v560_v35, 0.0  ;;  %v420_v59 = vmul.f32 %v416_v22, %v1500_v45  ;;  %v563_v61 = vsel %vm265_vm4, %v559_v39, 0.0 }
 0x12a   : > { %v529_v11 = vsel %vm400_vm11, %v508_v54, %v520_v53  ;;  %v550_v16 = vadd.f32 %v549_v52, %v548_v57  ;;  %v565_v17 = vadd.f32 %v564_v56, %v563_v61 }
 0x12b   : > { %v542_v23 = vsub.f32 %v1498_v44, %v529_v11  ;;  %v435_v62 = vmul.f32 %v431_v40, %v404_v10  ;;  %v426_v10 = vsel %vm265_vm4, %v420_v59, 0.0 }
 0x12c   : > { %v427_v35 = vadd.f32 %v426_v10, %v425_v7 }
 0x12d   : > { %v585_v63 = vpop.permute.xlu1 %584  ;;  %v583_v0 = vpop.permute.xlu0 %582  ;;  %v557_v41 = vsub.f32 0.0, %v542_v23 }
 0x131   : > { %v597_v14 = vpop.permute.xlu1 %596  ;;  %v595_v15 = vpop.permute.xlu0 %594 }
 0x132   : > { %v608_v30 = vsel %vm606_vm15, %v585_v63, %v597_v14  ;;  %v607_v31 = vsel %vm606_vm15, %v583_v0, %v595_v15  ;;  %v546_v63 = vmul.f32 %v542_v23, %v1498_v44  ;;  %v561_v0 = vmul.f32 %v557_v41, %v529_v11 }
 0x133   : > { %v621_v48 = vsub.f32 %v1496_v43, %v608_v30  ;;  %v620_v49 = vsub.f32 %v1494_v42, %v607_v31  ;;  %v441_v11 = vsel %vm265_vm4, %v435_v62, 0.0 }
 0x134   : > { %v566_v21 = vsel %vm265_vm4, %v561_v0, 0.0 }
 0x135   : > { %v522_v32 = vpop.permute.xlu1 %521  ;;  %v510_v33 = vpop.permute.xlu0 %509  ;;  %v625_v1 = vmul.f32 %v621_v48, %v1496_v43  ;;  %v636_v3 = vsub.f32 0.0, %v621_v48  ;;  %v635_v4 = vsub.f32 0.0, %v620_v49  ;;  %v624_v9 = vmul.f32 %v620_v49, %v1494_v42 }
 0x136   : > { %v530_v37 = vsel %vm400_vm11, %v510_v33, %v522_v32  ;;  %v551_v43 = vsel %vm265_vm4, %v546_v63, 0.0  ;;  %v567_v40 = vadd.f32 %v566_v21, %v565_v17 }
 0x137   : > { %v543_v53 = vsub.f32 %v1500_v45, %v530_v37  ;;  %v629_v23 = vsel %vm265_vm4, %v625_v1, 0.0  ;;  %v640_v42 = vmul.f32 %v636_v3, %v608_v30  ;;  %v639_v24 = vmul.f32 %v635_v4, %v607_v31 }
 0x138   : > { %v628_v26 = vsel %vm265_vm4, %v624_v9, 0.0  ;;  %v442_v31 = vadd.f32 %v441_v11, %v440_v8  ;;  %v552_v39 = vadd.f32 %v551_v43, %v550_v16  ;;  %v496_v11 = vadd.f32 %v495_v38, %v1669_v27 }
 0x139   : > { %v599_v54 = vpop.permute.xlu1 %598  ;;  %v587_v55 = vpop.permute.xlu0 %586  ;;  %v558_v12 = vsub.f32 0.0, %v543_v53  ;;  %v547_v28 = vmul.f32 %v543_v53, %v1500_v45  ;;  %v630_v41 = vadd.f32 %v629_v23, %v628_v26 }
 0x13a   : > { %v609_v60 = vsel %vm606_vm15, %v587_v55, %v599_v54  ;;  %v497_v27 = vsel %vm1478_vm7, %v496_v11, 0.0 }
 0x13b   : > { %v622_v5 = vsub.f32 %v1498_v44, %v609_v60  ;;  %v562_v29 = vmul.f32 %v558_v12, %v530_v37  ;;  %v644_v37 = vsel %vm265_vm4, %v640_v42, 0.0  ;;  %v553_v47 = vsel %vm265_vm4, %v547_v28, 0.0 }
 0x13c   : > { %v554_v57 = vadd.f32 %v553_v47, %v552_v39  ;;  %v662_v39 = vld [vmem:[%s1524_s4] sm:$0xff] }
 0x13d   : > { %v601_v14 = vpop.permute.xlu1 %600  ;;  %v589_v15 = vpop.permute.xlu0 %588  ;;  %v637_v25 = vsub.f32 0.0, %v622_v5  ;;  %v626_v32 = vmul.f32 %v622_v5, %v1498_v44  ;;  %v643_v44 = vsel %vm265_vm4, %v639_v24, 0.0  ;;  %v568_v20 = vsel %vm265_vm4, %v562_v29, 0.0 }
 0x13e   : > { %v610_v19 = vsel %vm606_vm15, %v589_v15, %v601_v14  ;;  %v645_v54 = vadd.f32 %v644_v37, %v643_v44  ;;  %v569_v59 = vadd.f32 %v568_v20, %v567_v40 }
 0x13f   : > { %v623_v22 = vsub.f32 %v1500_v45, %v610_v19  ;;  %v641_v46 = vmul.f32 %v637_v25, %v609_v60  ;;  %v631_v58 = vsel %vm265_vm4, %v626_v32, 0.0 }
 0x140   : > { %v632_v60 = vadd.f32 %v631_v58, %v630_v41 }
 0x141   : > { %v408_v33 = vpop.permute.xlu1 %407  ;;  %v406_v34 = vpop.permute.xlu0 %405  ;;  %v638_v36 = vsub.f32 0.0, %v623_v22  ;;  %v627_v18 = vmul.f32 %v623_v22, %v1500_v45  ;;  %v646_v61 = vsel %vm265_vm4, %v641_v46, 0.0 }
 0x142   : > { %v409_v30 = vsel %vm400_vm11, %v406_v34, %v408_v33  ;;  %v647_v15 = vadd.f32 %v646_v61, %v645_v54 }
 0x143   : > { %vm410_vm2 = vcmp.eq.s32.totalorder %v409_v30, 255  ;;  %v642_v50 = vmul.f32 %v638_v36, %v610_v19  ;;  %v633_v45 = vsel %vm265_vm4, %v627_v18, 0.0  ;;  %vm445_vm10 = vcmp.eq.s32.totalorder %v1473_v6, %v409_v30 }
 0x144   : > { %vm411_vm3 = vmor %vm297_vm6, %vm410_vm2  ;;  %v634_v16 = vadd.f32 %v633_v45, %v632_v60 }
 0x145   : > { %vm412_vm5 = vmxor %vm411_vm3, %vm1249_vm12  ;;  %v534_v48 = vpop.permute.xlu1 %533  ;;  %v532_v49 = vpop.permute.xlu0 %531  ;;  %v648_v3 = vsel %vm265_vm4, %v642_v50, 0.0 }
 0x146   : > { %v443_v51 = vsel %vm412_vm5, %v427_v35, 0.0  ;;  %v444_v52 = vsel %vm412_vm5, %v442_v31, 0.0  ;;  %v535_v53 = vsel %vm400_vm11, %v532_v49, %v534_v48  ;;  %v649_v19 = vadd.f32 %v648_v3, %v647_v15  ;;  %vm616_vm3 = vmand %vm1478_vm7, %vm369_vm1 }
 0x147   : > { %v446_v55 = vsub.f32 3.0, %v443_v51  ;;  %v449_v56 = vsub.f32 3.0, %v444_v52  ;;  %vm537_vm8 = vcmp.eq.s32.totalorder %v535_v53, 255  ;;  %vm572_vm2 = vcmp.eq.s32.totalorder %v1473_v6, %v535_v53 }
 0x148   : > { %vm538_vm9 = vmor %vm297_vm6, %vm537_vm8 }
 0x149   : > { %v447_v62 = vmax.f32 %v446_v55, 0.0  ;;  %v450_v63 = vmax.f32 %v449_v56, 0.0  ;;  %vm539_vm11 = vmxor %vm538_vm9, %vm1249_vm12  ;;  %v614_v0 = vpop.permute.xlu1 %613  ;;  %v612_v1 = vpop.permute.xlu0 %611 }
 0x14a   : > { %v570_v4 = vsel %vm539_vm11, %v554_v57, 0.0  ;;  %v571_v5 = vsel %vm539_vm11, %v569_v59, 0.0  ;;  %v615_v7 = vsel %vm606_vm15, %v612_v1, %v614_v0 }
 0x14b   : > { %v448_v8 = vsel %vm445_vm10, %v443_v51, %v447_v62  ;;  %v451_v9 = vsel %vm445_vm10, %v444_v52, %v450_v63  ;;  %v573_v12 = vsub.f32 3.0, %v570_v4  ;;  %v576_v14 = vsub.f32 3.0, %v571_v5 }
 0x14c   : > { %vm617_vm13 = vcmp.eq.s32.totalorder %v615_v7, 255  ;;  %v452_v43 = vadd.f32 %v451_v9, %v448_v8 }
 0x14d   : > { %v574_v17 = vmax.f32 %v573_v12, 0.0  ;;  %v577_v10 = vmax.f32 %v576_v14, 0.0  ;;  %vm618_vm14 = vmor %vm297_vm6, %vm617_vm13 }
 0x14e   : > { %vm619_vm15 = vmxor %vm618_vm14, %vm1249_vm12  ;;  %v453_v28 = vsel %vm368_vm0, %v452_v43, 0.0  ;;  %vm652_vm12 = vcmp.eq.s32.totalorder %v1473_v6, %v615_v7 }
 0x14f   : > { %v575_v21 = vsel %vm572_vm2, %v570_v4, %v574_v17  ;;  %v578_v22 = vsel %vm572_vm2, %v571_v5, %v577_v10  ;;  %v650_v23 = vsel %vm619_vm15, %v634_v16, 0.0  ;;  %v651_v24 = vsel %vm619_vm15, %v649_v19, 0.0  ;;  %vm536_vm6 = vmand %vm1478_vm7, %vm368_vm0 }
 0x150   : > { %v579_v42 = vadd.f32 %v578_v22, %v575_v21  ;;  %v653_v25 = vsub.f32 3.0, %v650_v23  ;;  %v656_v26 = vsub.f32 3.0, %v651_v24  ;;  %v498_v35 = vadd.f32 %v497_v27, %v453_v28 }
 0x152   : > { %v654_v29 = vmax.f32 %v653_v25, 0.0  ;;  %v657_v32 = vmax.f32 %v656_v26, 0.0  ;;  %v580_v33 = vsel %vm536_vm6, %v579_v42, 0.0 }
 0x153   : > { %v581_v30 = vadd.f32 %v580_v33, %v498_v35 }
 0x154   : > { %v655_v34 = vsel %vm652_vm12, %v650_v23, %v654_v29  ;;  %v658_v36 = vsel %vm652_vm12, %v651_v24, %v657_v32 }
 0x155   : > { %v659_v38 = vadd.f32 %v658_v36, %v655_v34 }
 0x157   : > { %v660_v31 = vsel %vm616_vm3, %v659_v38, 0.0 }
 0x158   : > { %v661_v40 = vadd.f32 %v660_v31, %v581_v30 }
 0x15a   : > { %v663_v6 = vadd.f32 %v662_v39, %v661_v40 }
 0x15c   : > { %664 = vst.msk [vmem:[%s1524_s4] sm:$0xff] %vm265_vm4, %v663_v6 }
 0x15d   : > { %1118 = shalt.err (!%p1115_p3)
}
 0x15e   : > { %s1119_s0 = scalar_lea.hbm %s1752_s14, 128  ;;  %s1123_s27 = scalar_lea.hbm %s1819_s2, 256 }
 0x15f   : > { %p1120_p6 = scmp.ne.s32.totalorder %s1752_s14, %s1119_s0  ;;  %p1124_p9 = scmp.lt.u32.totalorder %s1752_s14, %s1819_s2 }
 0x160   : > { %p1125_p10 = scmp.lt.u32.totalorder %s1123_s27, %s1119_s0  ;;  %p1127_p12 = scmp.lt.u32.totalorder %s1119_s0, %s1752_s14 }
 0x161   : > { %p1121_p7 = pnand %p1120_p6, %p1848_p1 }
 0x162   : > { %p1126_p11 = por %p1125_p10, %p1124_p9 }
 0x163   : > { %p1122_p4 = pneg %p1121_p7 }
 0x164   : > { %p1128_p2 = por %p1127_p12, %p1126_p11 }
 0x166   : > { %p1129_p13 = pnand %p1128_p2, %p1122_p4 }
 0x168   : > { %1132 = shalt.err (!%p1129_p13)
}
 0x169   : > { %889 = dma.vmem_to_hbm [thread:$0]  (%p1848_p1), %s1754_s23, 128, %s1752_s14, %s677_s17  }
 0x16a PF: > { %s1849_s6 = sld [smem:[#allocation16_spill]]  ;;  %s1850_s24 = sld [smem:[#allocation23_spill]] }
 0x16b   : > { %p908_p0 = scmp.ge.s32.totalorder %s1235_s22, 2 }
 0x170   : > { %s720_s25 = sand.u32 1, %s1849_s6   ;;  %p1851_p5 = scmp.ne.s32.totalorder %s1850_s24, 0 }
 0x171   : > { %s721_s12 = scalar_lea.sflag [#allocation6], %s720_s25 }
 0x172   : > { %p901_p8 = pnand %p908_p0, %p1851_p5 }
 0x174   : > { %1186 = dma.done.wait (!%p901_p8), %s721_s12, 128  }
 0x175   : > { %1188 = vsyncadd (!%p901_p8), %s721_s12, 4294967168  ;;  %s730_s10 = scalar_lea.sflag [#allocation11], %s720_s25 }
 0x176   : > { %1190 = dma.done.wait (!%p901_p8), %s730_s10, 128  }
 0x177   : > { %1192 = vsyncadd (!%p901_p8), %s730_s10, 4294967168  ;;  %s26_s22 = sadd.s32 1, %s1235_s22   ;;  %s1852_s7 = sld [smem:[#allocation17_spill]] }
 0x178   : > { %p23_p3 = scmp.ge.s32.totalorder %s26_s22, 6   ;;  %s1853_s14 = sld [smem:[#allocation21_spill]] }
 0x179   : > { %s1854_s26 = sld [smem:[#allocation18_spill]]  ;;  %s1855_s17 = sld [smem:[#allocation22_spill]] }
 0x17a   : > { %s1856_s23 = sld [smem:[#allocation19_spill]]  ;;  %s1857_s28 = sld [smem:[#allocation20_spill]] }
 0x17b   : > { %s1858_s12 = smov %s1199_s13  ;;  %s1860_s15 = smov %s1211_s16 }
 0x17c   : > { %s1862_s18 = smov %s1227_s20  ;;  %s1863_s19 = smov %s1231_s21 }
 0x17d   : > { %s1859_s13 = smov %s1852_s7  ;;  %25 = sbr.rel (!%p23_p3) target bundleno = 15 (0xf), region = 107 }
 0x17f   : > { %s1861_s16 = smov %s1854_s26 }
 0x180   : > { %s1864_s20 = smov %s1856_s23  ;;  %s1865_s21 = smov %s1857_s28 }
 0x184   :  { %735 = vsyncpa [#allocation5], 1 }
 0x185   :  { %737 = vsyncpa [#allocation5 + $0x1], 1 }
 0x186   :  { %738 = vsyncpa [#allocation8], 1 }
 0x187   :  { %740 = vsyncpa [#allocation8 + $0x1], 1 }
 0x188   :  { %741 = vsyncpa [#allocation6], 1 }
 0x189   :  { %743 = vsyncpa [#allocation6 + $0x1], 1 }
 0x18a   :  { %744 = vsyncpa [#allocation11], 1 }
 0x18b   :  { %746 = vsyncpa [#allocation11 + $0x1], 1 }

</bundles_post_ra>
